<compile_context>
chip_gen: v7x
topology: tpu7x:2x2x1
jax: 0.10.0
libtpu: 0.0.40
codegen_flags: <defaults>
</compile_context>

<pallas_src>
import jax
import jax.numpy as jnp
from jax.experimental import pallas as pl
from jax.experimental.pallas import tpu as pltpu

_MAX_DMA_CHUNKS = 4  # review: "optionally chunked into 2-4 DMAs"


def _plan_chunks(shape):
    """Static (start, size) chunks along axis 0, or None for a single whole-array DMA."""
    if len(shape) == 0 or shape[0] <= 1:
        return None
    lead = int(shape[0])
    n = min(_MAX_DMA_CHUNKS, lead)
    base, rem = divmod(lead, n)
    chunks = []
    start = 0
    for i in range(n):
        size = base + (1 if i < rem else 0)
        chunks.append((start, size))
        start += size
    return chunks


def _make_dma_copy_kernel(chunks):
    """Kernel: direct HBM→HBM async copies of `value` into the output buffer."""

    def kernel(src_hbm, dst_hbm, sems):
        if chunks is None:
            cp = pltpu.make_async_copy(src_hbm, dst_hbm, sems.at[0])
            cp.start()
            cp.wait()
            return
        cps = []
        for i, (start, size) in enumerate(chunks):
            cp = pltpu.make_async_copy(
                src_hbm.at[pl.ds(start, size)],
                dst_hbm.at[pl.ds(start, size)],
                sems.at[i],
            )
            cp.start()  # issue all DMAs first so they overlap
            cps.append(cp)
        for cp in cps:
            cp.wait()

    return kernel


@jax.jit
def value_mod_materialize(value: jax.Array) -> jax.Array:
    """Fresh buffer equal to `value` via a direct HBM→HBM DMA (no VMEM staging)."""
    chunks = _plan_chunks(value.shape)
    n_sems = 1 if chunks is None else len(chunks)
    return pl.pallas_call(
        _make_dma_copy_kernel(chunks),
        out_shape=jax.ShapeDtypeStruct(value.shape, value.dtype),
        in_specs=[pl.BlockSpec(memory_space=pl.ANY)],   # raw HBM ref, no auto-DMA
        out_specs=pl.BlockSpec(memory_space=pl.ANY),    # raw HBM ref, no auto-DMA
        scratch_shapes=[pltpu.SemaphoreType.DMA((n_sems,))],
    )(value)


class ValueMod:
    """JAX analogue of hippynn.layers.algebra.ValueMod.

    forward() == __call__() returns the stored buffer directly (zero kernel
    launches, exactly matching PyTorch's `return self.value`). Pass
    materialize=True to produce a fresh HBM copy via the direct-DMA Pallas kernel.
    """

    def __init__(self, value):
        if not isinstance(value, jnp.ndarray):
            value = jnp.asarray(value, dtype=jnp.float32)
        self.value = value

    def extra_repr(self):
        return str(self.value)

    def __call__(self, materialize: bool = False):
        if materialize:
            return value_mod_materialize(self.value)
        # Forward pass is an identity on a stored constant: no kernel at all.
        return self.value


if __name__ == "__main__":
    # Deterministic "buffer" initialization (synthetic; no checkpoint load).
    key = jax.random.PRNGKey(0)
    value = jax.random.normal(key, (8, 128), dtype=jnp.float32)

    mod = ValueMod(value)

    # Fast path: identity return of the stored constant (no kernel launch).
    out_fast = jax.block_until_ready(mod())
    assert out_fast.shape == value.shape and out_fast.dtype == value.dtype
    assert bool(jnp.array_equal(out_fast, value))

    # Pallas path: direct HBM->HBM DMA producing a fresh buffer.
    out_copy = jax.block_until_ready(mod(materialize=True))
    assert out_copy.shape == value.shape and out_copy.dtype == value.dtype
    assert bool(jnp.array_equal(out_copy, value))

    # Also exercise a ragged / non-128-multiple shape (no padding needed anymore).
    ragged = jax.random.normal(jax.random.PRNGKey(0), (7, 37), dtype=jnp.float32)
    out_ragged = jax.block_until_ready(value_mod_materialize(ragged))
    assert bool(jnp.array_equal(out_ragged, ragged))

    print("KERNEL_OK")
</pallas_src>

<mosaic_0001>
module attributes {stable_mosaic.version = 11 : i64} {
  func.func @kernel(%arg0: memref<8x128xf32, #tpu.memory_space<any>>, %arg1: memref<8x128xf32, #tpu.memory_space<any>>, %arg2: memref<4x!tpu.dma_semaphore, #tpu.memory_space<semaphore_mem>>) attributes {dimension_semantics = [], scalar_prefetch = 0 : i64, scratch_operands = 1 : i64, tpu.core_type = #tpu.core_type<tc>} {
    %c0_i32 = arith.constant 0 : i32
    %c0_i32_0 = arith.constant 0 : i32
    %c0_i32_1 = arith.constant 0 : i32
    %0 = tpu.memref_slice %arg0[%c0_i32_0, %c0_i32_1] : memref<8x128xf32, #tpu.memory_space<any>> -> memref<2x128xf32, #tpu.memory_space<any>>
    %c0_i32_2 = arith.constant 0 : i32
    %c0_i32_3 = arith.constant 0 : i32
    %1 = tpu.memref_slice %arg1[%c0_i32_2, %c0_i32_3] : memref<8x128xf32, #tpu.memory_space<any>> -> memref<2x128xf32, #tpu.memory_space<any>>
    %2 = tpu.memref_slice %arg2[%c0_i32] : memref<4x!tpu.dma_semaphore, #tpu.memory_space<semaphore_mem>> -> memref<1x!tpu.dma_semaphore, #tpu.memory_space<semaphore_mem>>
    %3 = tpu.memref_squeeze %2 : memref<1x!tpu.dma_semaphore, #tpu.memory_space<semaphore_mem>> -> memref<!tpu.dma_semaphore, #tpu.memory_space<semaphore_mem>>
    tpu.enqueue_dma source(%0 : memref<2x128xf32, #tpu.memory_space<any>>) target(%1 : memref<2x128xf32, #tpu.memory_space<any>>) target_semaphore(%3 : memref<!tpu.dma_semaphore, #tpu.memory_space<semaphore_mem>>)
    %c1_i32 = arith.constant 1 : i32
    %c2_i32 = arith.constant 2 : i32
    %c0_i32_4 = arith.constant 0 : i32
    %4 = tpu.memref_slice %arg0[%c2_i32, %c0_i32_4] : memref<8x128xf32, #tpu.memory_space<any>> -> memref<2x128xf32, #tpu.memory_space<any>>
    %c2_i32_5 = arith.constant 2 : i32
    %c0_i32_6 = arith.constant 0 : i32
    %5 = tpu.memref_slice %arg1[%c2_i32_5, %c0_i32_6] : memref<8x128xf32, #tpu.memory_space<any>> -> memref<2x128xf32, #tpu.memory_space<any>>
    %6 = tpu.memref_slice %arg2[%c1_i32] : memref<4x!tpu.dma_semaphore, #tpu.memory_space<semaphore_mem>> -> memref<1x!tpu.dma_semaphore, #tpu.memory_space<semaphore_mem>>
    %7 = tpu.memref_squeeze %6 : memref<1x!tpu.dma_semaphore, #tpu.memory_space<semaphore_mem>> -> memref<!tpu.dma_semaphore, #tpu.memory_space<semaphore_mem>>
    tpu.enqueue_dma source(%4 : memref<2x128xf32, #tpu.memory_space<any>>) target(%5 : memref<2x128xf32, #tpu.memory_space<any>>) target_semaphore(%7 : memref<!tpu.dma_semaphore, #tpu.memory_space<semaphore_mem>>)
    %c2_i32_7 = arith.constant 2 : i32
    %c4_i32 = arith.constant 4 : i32
    %c0_i32_8 = arith.constant 0 : i32
    %8 = tpu.memref_slice %arg0[%c4_i32, %c0_i32_8] : memref<8x128xf32, #tpu.memory_space<any>> -> memref<2x128xf32, #tpu.memory_space<any>>
    %c4_i32_9 = arith.constant 4 : i32
    %c0_i32_10 = arith.constant 0 : i32
    %9 = tpu.memref_slice %arg1[%c4_i32_9, %c0_i32_10] : memref<8x128xf32, #tpu.memory_space<any>> -> memref<2x128xf32, #tpu.memory_space<any>>
    %10 = tpu.memref_slice %arg2[%c2_i32_7] : memref<4x!tpu.dma_semaphore, #tpu.memory_space<semaphore_mem>> -> memref<1x!tpu.dma_semaphore, #tpu.memory_space<semaphore_mem>>
    %11 = tpu.memref_squeeze %10 : memref<1x!tpu.dma_semaphore, #tpu.memory_space<semaphore_mem>> -> memref<!tpu.dma_semaphore, #tpu.memory_space<semaphore_mem>>
    tpu.enqueue_dma source(%8 : memref<2x128xf32, #tpu.memory_space<any>>) target(%9 : memref<2x128xf32, #tpu.memory_space<any>>) target_semaphore(%11 : memref<!tpu.dma_semaphore, #tpu.memory_space<semaphore_mem>>)
    %c3_i32 = arith.constant 3 : i32
    %c6_i32 = arith.constant 6 : i32
    %c0_i32_11 = arith.constant 0 : i32
    %12 = tpu.memref_slice %arg0[%c6_i32, %c0_i32_11] : memref<8x128xf32, #tpu.memory_space<any>> -> memref<2x128xf32, #tpu.memory_space<any>>
    %c6_i32_12 = arith.constant 6 : i32
    %c0_i32_13 = arith.constant 0 : i32
    %13 = tpu.memref_slice %arg1[%c6_i32_12, %c0_i32_13] : memref<8x128xf32, #tpu.memory_space<any>> -> memref<2x128xf32, #tpu.memory_space<any>>
    %14 = tpu.memref_slice %arg2[%c3_i32] : memref<4x!tpu.dma_semaphore, #tpu.memory_space<semaphore_mem>> -> memref<1x!tpu.dma_semaphore, #tpu.memory_space<semaphore_mem>>
    %15 = tpu.memref_squeeze %14 : memref<1x!tpu.dma_semaphore, #tpu.memory_space<semaphore_mem>> -> memref<!tpu.dma_semaphore, #tpu.memory_space<semaphore_mem>>
    tpu.enqueue_dma source(%12 : memref<2x128xf32, #tpu.memory_space<any>>) target(%13 : memref<2x128xf32, #tpu.memory_space<any>>) target_semaphore(%15 : memref<!tpu.dma_semaphore, #tpu.memory_space<semaphore_mem>>)
    %c0_i32_14 = arith.constant 0 : i32
    %c0_i32_15 = arith.constant 0 : i32
    %c0_i32_16 = arith.constant 0 : i32
    %16 = tpu.memref_slice %arg0[%c0_i32_15, %c0_i32_16] : memref<8x128xf32, #tpu.memory_space<any>> -> memref<2x128xf32, #tpu.memory_space<any>>
    %c0_i32_17 = arith.constant 0 : i32
    %c0_i32_18 = arith.constant 0 : i32
    %17 = tpu.memref_slice %arg1[%c0_i32_17, %c0_i32_18] : memref<8x128xf32, #tpu.memory_space<any>> -> memref<2x128xf32, #tpu.memory_space<any>>
    %18 = tpu.memref_slice %arg2[%c0_i32_14] : memref<4x!tpu.dma_semaphore, #tpu.memory_space<semaphore_mem>> -> memref<1x!tpu.dma_semaphore, #tpu.memory_space<semaphore_mem>>
    %19 = tpu.memref_squeeze %18 : memref<1x!tpu.dma_semaphore, #tpu.memory_space<semaphore_mem>> -> memref<!tpu.dma_semaphore, #tpu.memory_space<semaphore_mem>>
    tpu.wait_dma2 semaphore(%19 : memref<!tpu.dma_semaphore, #tpu.memory_space<semaphore_mem>>) src(%16 : memref<2x128xf32, #tpu.memory_space<any>>) dst(%17 : memref<2x128xf32, #tpu.memory_space<any>>)
    %c1_i32_19 = arith.constant 1 : i32
    %c2_i32_20 = arith.constant 2 : i32
    %c0_i32_21 = arith.constant 0 : i32
    %20 = tpu.memref_slice %arg0[%c2_i32_20, %c0_i32_21] : memref<8x128xf32, #tpu.memory_space<any>> -> memref<2x128xf32, #tpu.memory_space<any>>
    %c2_i32_22 = arith.constant 2 : i32
    %c0_i32_23 = arith.constant 0 : i32
    %21 = tpu.memref_slice %arg1[%c2_i32_22, %c0_i32_23] : memref<8x128xf32, #tpu.memory_space<any>> -> memref<2x128xf32, #tpu.memory_space<any>>
    %22 = tpu.memref_slice %arg2[%c1_i32_19] : memref<4x!tpu.dma_semaphore, #tpu.memory_space<semaphore_mem>> -> memref<1x!tpu.dma_semaphore, #tpu.memory_space<semaphore_mem>>
    %23 = tpu.memref_squeeze %22 : memref<1x!tpu.dma_semaphore, #tpu.memory_space<semaphore_mem>> -> memref<!tpu.dma_semaphore, #tpu.memory_space<semaphore_mem>>
    tpu.wait_dma2 semaphore(%23 : memref<!tpu.dma_semaphore, #tpu.memory_space<semaphore_mem>>) src(%20 : memref<2x128xf32, #tpu.memory_space<any>>) dst(%21 : memref<2x128xf32, #tpu.memory_space<any>>)
    %c2_i32_24 = arith.constant 2 : i32
    %c4_i32_25 = arith.constant 4 : i32
    %c0_i32_26 = arith.constant 0 : i32
    %24 = tpu.memref_slice %arg0[%c4_i32_25, %c0_i32_26] : memref<8x128xf32, #tpu.memory_space<any>> -> memref<2x128xf32, #tpu.memory_space<any>>
    %c4_i32_27 = arith.constant 4 : i32
    %c0_i32_28 = arith.constant 0 : i32
    %25 = tpu.memref_slice %arg1[%c4_i32_27, %c0_i32_28] : memref<8x128xf32, #tpu.memory_space<any>> -> memref<2x128xf32, #tpu.memory_space<any>>
    %26 = tpu.memref_slice %arg2[%c2_i32_24] : memref<4x!tpu.dma_semaphore, #tpu.memory_space<semaphore_mem>> -> memref<1x!tpu.dma_semaphore, #tpu.memory_space<semaphore_mem>>
    %27 = tpu.memref_squeeze %26 : memref<1x!tpu.dma_semaphore, #tpu.memory_space<semaphore_mem>> -> memref<!tpu.dma_semaphore, #tpu.memory_space<semaphore_mem>>
    tpu.wait_dma2 semaphore(%27 : memref<!tpu.dma_semaphore, #tpu.memory_space<semaphore_mem>>) src(%24 : memref<2x128xf32, #tpu.memory_space<any>>) dst(%25 : memref<2x128xf32, #tpu.memory_space<any>>)
    %c3_i32_29 = arith.constant 3 : i32
    %c6_i32_30 = arith.constant 6 : i32
    %c0_i32_31 = arith.constant 0 : i32
    %28 = tpu.memref_slice %arg0[%c6_i32_30, %c0_i32_31] : memref<8x128xf32, #tpu.memory_space<any>> -> memref<2x128xf32, #tpu.memory_space<any>>
    %c6_i32_32 = arith.constant 6 : i32
    %c0_i32_33 = arith.constant 0 : i32
    %29 = tpu.memref_slice %arg1[%c6_i32_32, %c0_i32_33] : memref<8x128xf32, #tpu.memory_space<any>> -> memref<2x128xf32, #tpu.memory_space<any>>
    %30 = tpu.memref_slice %arg2[%c3_i32_29] : memref<4x!tpu.dma_semaphore, #tpu.memory_space<semaphore_mem>> -> memref<1x!tpu.dma_semaphore, #tpu.memory_space<semaphore_mem>>
    %31 = tpu.memref_squeeze %30 : memref<1x!tpu.dma_semaphore, #tpu.memory_space<semaphore_mem>> -> memref<!tpu.dma_semaphore, #tpu.memory_space<semaphore_mem>>
    tpu.wait_dma2 semaphore(%31 : memref<!tpu.dma_semaphore, #tpu.memory_space<semaphore_mem>>) src(%28 : memref<2x128xf32, #tpu.memory_space<any>>) dst(%29 : memref<2x128xf32, #tpu.memory_space<any>>)
    return
  }
}

</mosaic_0001>

<bundles_post_ra>
// kernel: value_mod_materialize.1
= control target key start
LH: loop header
LB: loop body
LE: loop exit
PB: predicated region body
PF: predicated region fallthrough
CT: control target
= control target key end

     0   :  { %s124_s9 = smov [#allocation2]   ;;  %s125_s10 = smov [#allocation3]   ;;  %s167_s0 = inlined_call_operand.hbm [shape: f32[8,128], index: 0, kind: input, shape index: {}]   ;;  %s168_s1 = inlined_call_operand.hbm [shape: f32[8,128], index: 1, kind: output, shape index: {}]  }
   0x1   :  { %s19_s8 = scalar_lea.hbm %s167_s0, 32  ;;  %s126_s11 = smov 0  }
   0x2   :  { %18 = dma.general %s167_s0, 32, %s168_s1, %s124_s9, %s125_s10, [#allocation4], %s126_s11, 0  }
   0x3   :  { %s20_s18 = scalar_lea.hbm %s168_s1, 32  ;;  %s35_s21 = scalar_lea.hbm %s167_s0, 64 }
   0x4   :  { %s127_s22 = smov [#allocation2 + $0x1]   ;;  %s128_s23 = smov [#allocation5]  }
   0x5   :  { %34 = dma.general %s19_s8, 32, %s20_s18, %s127_s22, %s128_s23, [#allocation6], %s126_s11, 0  }
   0x6   :  { %s36_s26 = scalar_lea.hbm %s168_s1, 64  ;;  %s51_s29 = scalar_lea.hbm %s167_s0, 96 }
   0x7   :  { %s129_s30 = smov [#allocation2 + $0x2]   ;;  %s130_s2 = smov [#allocation7]  }
   0x8   :  { %50 = dma.general %s35_s21, 32, %s36_s26, %s129_s30, %s130_s2, [#allocation8], %s126_s11, 0  }
   0x9   :  { %s52_s5 = scalar_lea.hbm %s168_s1, 96  ;;  %s131_s6 = smov [#allocation2 + $0x3]  }
   0xa   :  { %s132_s7 = smov [#allocation9]  }
   0xb   :  { %66 = dma.general %s51_s29, 32, %s52_s5, %s131_s6, %s132_s7, [#allocation10], %s126_s11, 0  }
   0xc   :  { %116 = dma.done.wait [#allocation2], 32 }
   0xd   :  { %117 = vsyncadd [#allocation2], 4294967264 }
   0xe   :  { %118 = dma.done.wait [#allocation2 + $0x1], 32 }
   0xf   :  { %119 = vsyncadd [#allocation2 + $0x1], 4294967264 }
  0x10   :  { %120 = dma.done.wait [#allocation2 + $0x2], 32 }
  0x11   :  { %121 = vsyncadd [#allocation2 + $0x2], 4294967264 }
  0x12   :  { %122 = dma.done.wait [#allocation2 + $0x3], 32 }
  0x13   :  { %123 = vsyncadd [#allocation2 + $0x3], 4294967264 }
  0x14   :  { %76 = vsyncmov [#allocation2] }
  0x17   :  { %s77_s0 = vpop.sfrf %76 }
  0x18   :  { %p103_p0 = scmp.ne.s32.totalorder %s77_s0, 0 }
  0x1a   :  { %81 = shalt.err (%p103_p0)  }
  0x1b   :  { %83 = vsyncmov [#allocation2 + $0x1] }
  0x1e   :  { %s84_s8 = vpop.sfrf %83 }
  0x1f   :  { %p104_p1 = scmp.ne.s32.totalorder %s84_s8, 0 }
  0x21   :  { %88 = shalt.err (%p104_p1)  }
  0x22   :  { %90 = vsyncmov [#allocation2 + $0x2] }
  0x25   :  { %s91_s1 = vpop.sfrf %90 }
  0x26   :  { %p105_p2 = scmp.ne.s32.totalorder %s91_s1, 0 }
  0x28   :  { %95 = shalt.err (%p105_p2)  }
  0x29   :  { %97 = vsyncmov [#allocation2 + $0x3] }
  0x2c   :  { %s98_s9 = vpop.sfrf %97 }
  0x2d   :  { %p106_p3 = scmp.ne.s32.totalorder %s98_s9, 0 }
  0x2f   :  { %102 = shalt.err (%p106_p3)  }

</bundles_post_ra>
